<compile_context>
chip_gen: v7x
topology: tpu7x:2x2x1
jax: 0.10.0
libtpu: 0.0.40
codegen_flags: <defaults>
</compile_context>

<pallas_src>
import functools

import jax
import jax.numpy as jnp
from jax.experimental import pallas as pl
from jax.experimental.pallas import tpu as pltpu

VAE_DIM = 16          # config['vae']['dim']
UP_DIM = 32           # config['vae']['up_dim']
MEL_CH = 80
TEXT_CH = 256         # text-encoding width (the +1 duration lane is folded in
                      # as a rank-1 update so the big stream stays 256-aligned)


def _vae_kernel(mel_ref, out_ref, dur_ref, teps_ref,
                w_mel_ref, b_mel_ref,
                w_tout_ref, w_tdur_ref, b_text_ref,
                w_up_ref, b_up_ref,
                z_ref, mu_ref, lv_ref, tmu_ref, tlv_ref,
                *, precision):
    f32 = jnp.float32

    # nan_to_num on the mel branch (nan -> 0, +-inf -> finite max/min).
    # Upcast happens in-register; inputs may arrive as bf16.
    x = mel_ref[...].astype(f32)
    x = jnp.where(jnp.isnan(x), jnp.float32(0.0), x)
    x = jnp.clip(x, jnp.finfo(f32).min, jnp.finfo(f32).max)

    # Fused mel projection: [mu | logvar] in one MXU push.
    mel_proj = jnp.dot(x, w_mel_ref[...], precision=precision,
                       preferred_element_type=f32) + b_mel_ref[...]
    mu = mel_proj[:, :VAE_DIM]
    lv = mel_proj[:, VAE_DIM:]

    # Fused text projection: [text_mu | text_logvar].
    #   concat(dur, output) @ W == output @ W[1:] + dur * W[0:1]
    t = out_ref[...].astype(f32)
    text_proj = jnp.dot(t, w_tout_ref[...], precision=precision,
                        preferred_element_type=f32)
    text_proj = (text_proj
                 + dur_ref[...].astype(f32) * w_tdur_ref[...]
                 + b_text_ref[...])
    tmu = text_proj[:, :VAE_DIM]
    tlv = text_proj[:, VAE_DIM:]

    # Reparameterize (PyTorch also draws `eps` but never uses it).
    std = jnp.exp(0.5 * lv)
    tstd = jnp.exp(0.5 * tlv)
    z_lat = (teps_ref[...].astype(f32) * tstd + tmu) * std + mu

    # Up projection (1x1 Conv1d).
    z = jnp.dot(z_lat, w_up_ref[...], precision=precision,
                preferred_element_type=f32) + b_up_ref[...]

    # Direct per-output stores: no in-kernel concat, no slab unpack afterwards.
    # The narrow masked stores are cheap — the kernel is HBM/DMA-bound.
    z_ref[...] = z.astype(z_ref.dtype)
    mu_ref[...] = mu.astype(mu_ref.dtype)
    lv_ref[...] = lv.astype(lv_ref.dtype)
    tmu_ref[...] = tmu.astype(tmu_ref.dtype)
    tlv_ref[...] = tlv.astype(tlv_ref.dtype)


def vae_forward(mel_mean, output, durations, params, text_eps, *,
                tm=2048, precision=None):
    """mel_mean: (B,T,80), output: (B,T,256), durations: (B,T), text_eps: (B,T,16).

    Inputs are used in their native dtype (no wrapper-side casts); elementwise
    math runs in f32 in-register.  `precision` is forwarded to the in-kernel
    matmuls (default MXU precision truncates f32 operands to bf16).
    """
    B, T, _ = mel_mean.shape
    N = B * T
    out_dtype = jnp.result_type(mel_mean.dtype, output.dtype)

    # (B,T,C) -> (N,C) reshapes are metadata-only for contiguous arrays.
    mel2 = mel_mean.reshape(N, MEL_CH)
    out2 = output.reshape(N, TEXT_CH)
    dur2 = durations.reshape(N, 1)
    teps2 = text_eps.reshape(N, VAE_DIM)

    # Row tile: as large as VMEM comfortably allows (fewer ~0.35us grid steps),
    # but capped at ~N/2 (rounded to 8) so the 'parallel' grid axis has >=2
    # steps and can shard across v7x's two TensorCores.  Ragged tails are
    # handled by Pallas' masked boundary blocks — no jnp.pad / [:N] copies.
    tm_cap = max(8, ((pl.cdiv(N, 2) + 7) // 8) * 8)
    tm = max(8, min(tm, tm_cap))
    grid = (pl.cdiv(N, tm),)

    (w_mu, b_mu, w_lv, b_lv, w_tmu, b_tmu, w_tlv, b_tlv, w_up, b_up) = params
    # Fuse per-branch weight pairs (tiny one-time concats on the host graph).
    w_mel = jnp.concatenate([w_mu, w_lv], axis=1)       # (80, 32)
    b_mel = jnp.concatenate([b_mu, b_lv], axis=1)       # (1, 32)
    w_text = jnp.concatenate([w_tmu, w_tlv], axis=1)    # (257, 32)
    w_tdur = w_text[0:1, :]                             # (1, 32)   duration row
    w_tout = w_text[1:, :]                              # (256, 32)
    b_text = jnp.concatenate([b_tmu, b_tlv], axis=1)    # (1, 32)

    row_spec = lambda cols: pl.BlockSpec((tm, cols), lambda i: (i, 0))
    full_spec = lambda r, c: pl.BlockSpec((r, c), lambda i: (0, 0))

    in_specs = [
        row_spec(MEL_CH),                 # mel
        row_spec(TEXT_CH),                # text encoding (256-lane aligned)
        row_spec(1),                      # durations
        row_spec(VAE_DIM),                # text_eps
        full_spec(MEL_CH, 2 * VAE_DIM),   # w_mel
        full_spec(1, 2 * VAE_DIM),        # b_mel
        full_spec(TEXT_CH, 2 * VAE_DIM),  # w_tout
        full_spec(1, 2 * VAE_DIM),        # w_tdur
        full_spec(1, 2 * VAE_DIM),        # b_text
        full_spec(VAE_DIM, UP_DIM),       # w_up
        full_spec(1, UP_DIM),             # b_up
    ]
    out_widths = (UP_DIM, VAE_DIM, VAE_DIM, VAE_DIM, VAE_DIM)
    out_specs = [row_spec(w) for w in out_widths]
    out_shape = tuple(jax.ShapeDtypeStruct((N, w), out_dtype) for w in out_widths)

    z, mu, lv, tmu, tlv = pl.pallas_call(
        functools.partial(_vae_kernel, precision=precision),
        out_shape=out_shape,
        grid_spec=pltpu.PrefetchScalarGridSpec(
            num_scalar_prefetch=0,
            grid=grid,
            in_specs=in_specs,
            out_specs=out_specs,
        ),
        compiler_params=pltpu.CompilerParams(
            dimension_semantics=("parallel",),
            # tm=2048 double-buffered (f32, lane-padded) is ~20 MiB; raise the
            # scoped limit above v5e's 16 MiB default, stay within v7x budget.
            vmem_limit_bytes=32 * 1024 * 1024,
        ),
    )(mel2, out2, dur2, teps2,
      w_mel, b_mel, w_tout, w_tdur, b_text, w_up, b_up)

    # (N,w) -> (B,T,w) reshapes are metadata-only.
    return (z.reshape(B, T, UP_DIM),
            mu.reshape(B, T, VAE_DIM),
            lv.reshape(B, T, VAE_DIM),
            tmu.reshape(B, T, VAE_DIM),
            tlv.reshape(B, T, VAE_DIM))


def init_params(key):
    """Deterministic Conv1d(k=1) parameters stored transposed as (in, out)."""
    ks = jax.random.split(key, 10)

    def conv_init(kw, kb, cin, cout):
        # mimic PyTorch default uniform(-1/sqrt(fan_in), 1/sqrt(fan_in))
        bound = 1.0 / jnp.sqrt(cin)
        w = jax.random.uniform(kw, (cin, cout), jnp.float32, -bound, bound)
        b = jax.random.uniform(kb, (1, cout), jnp.float32, -bound, bound)
        return w, b

    w_mu, b_mu = conv_init(ks[0], ks[1], MEL_CH, VAE_DIM)
    w_lv, b_lv = conv_init(ks[2], ks[3], MEL_CH, VAE_DIM)
    w_tmu, b_tmu = conv_init(ks[4], ks[5], TEXT_CH + 1, VAE_DIM)
    w_tlv, b_tlv = conv_init(ks[6], ks[7], TEXT_CH + 1, VAE_DIM)
    w_up, b_up = conv_init(ks[8], ks[9], VAE_DIM, UP_DIM)
    return (w_mu, b_mu, w_lv, b_lv, w_tmu, b_tmu, w_tlv, b_tlv, w_up, b_up)


def vae_reference(mel_mean, output, durations, params, text_eps):
    """Plain-JAX reference mirroring the PyTorch forward."""
    (w_mu, b_mu, w_lv, b_lv, w_tmu, b_tmu, w_tlv, b_tlv, w_up, b_up) = params
    text_in = jnp.concatenate([durations[..., None], output], axis=-1)
    tmu = text_in @ w_tmu + b_tmu
    tlv = text_in @ w_tlv + b_tlv
    x = jnp.nan_to_num(mel_mean)
    mu = x @ w_mu + b_mu
    lv = x @ w_lv + b_lv
    std, tstd = jnp.exp(0.5 * lv), jnp.exp(0.5 * tlv)
    z_lat = (text_eps * tstd + tmu) * std + mu
    z = z_lat @ w_up + b_up
    return z, mu, lv, tmu, tlv


if __name__ == "__main__":
    key = jax.random.PRNGKey(0)
    k_param, k_mel, k_out, k_dur, k_teps = jax.random.split(key, 5)

    # T=19 deliberately not a multiple of 8 to exercise the ragged-tail path
    # (N=38 -> tm=24, grid of 2 with a masked boundary block).
    B, T = 2, 19
    params = init_params(k_param)

    mel_mean = jax.random.normal(k_mel, (B, T, MEL_CH), jnp.float32)
    mel_mean = mel_mean.at[0, 0, 0].set(jnp.nan)   # exercise nan_to_num
    output = jax.random.normal(k_out, (B, T, TEXT_CH), jnp.float32)
    durations = jax.random.uniform(k_dur, (B, T), jnp.float32, 0.0, 10.0)
    # reparameterization noise (standard normal), fixed so kernel == reference.
    text_eps = jax.random.normal(k_teps, (B, T, VAE_DIM), jnp.float32)

    outs = vae_forward(mel_mean, output, durations, params, text_eps)
    outs = jax.block_until_ready(outs)

    refs = vae_reference(mel_mean, output, durations, params, text_eps)
    for o, r in zip(outs, refs):
        assert o.shape == r.shape, (o.shape, r.shape)
        assert jnp.allclose(o, r, atol=1e-4, rtol=1e-4), "mismatch vs reference"

    print("KERNEL_OK")
</pallas_src>

<mosaic_0001>
module attributes {stable_mosaic.version = 11 : i64} {
  func.func @_vae_kernel(%arg0: i32, %arg1: memref<24x80xf32, #tpu.memory_space<vmem>>, %arg2: memref<24x256xf32, #tpu.memory_space<vmem>>, %arg3: memref<24x1xf32, #tpu.memory_space<vmem>>, %arg4: memref<24x16xf32, #tpu.memory_space<vmem>>, %arg5: memref<80x32xf32, #tpu.memory_space<vmem>>, %arg6: memref<1x32xf32, #tpu.memory_space<vmem>>, %arg7: memref<256x32xf32, #tpu.memory_space<vmem>>, %arg8: memref<1x32xf32, #tpu.memory_space<vmem>>, %arg9: memref<1x32xf32, #tpu.memory_space<vmem>>, %arg10: memref<16x32xf32, #tpu.memory_space<vmem>>, %arg11: memref<1x32xf32, #tpu.memory_space<vmem>>, %arg12: memref<24x32xf32, #tpu.memory_space<vmem>>, %arg13: memref<24x16xf32, #tpu.memory_space<vmem>>, %arg14: memref<24x16xf32, #tpu.memory_space<vmem>>, %arg15: memref<24x16xf32, #tpu.memory_space<vmem>>, %arg16: memref<24x16xf32, #tpu.memory_space<vmem>>) attributes {dimension_semantics = [#tpu.dimension_semantics<parallel>], iteration_bounds = array<i64: 2>, scalar_prefetch = 0 : i64, scratch_operands = 0 : i64, tpu.core_type = #tpu.core_type<tc>, window_params = [{transform_indices = @transform_0, window_bounds = array<i64: 24, 80>}, {transform_indices = @transform_1, window_bounds = array<i64: 24, 256>}, {transform_indices = @transform_2, window_bounds = array<i64: 24, 1>}, {transform_indices = @transform_3, window_bounds = array<i64: 24, 16>}, {pipeline_mode = #tpu.pipeline_mode<synchronous>, transform_indices = @transform_4, window_bounds = array<i64: 80, 32>}, {pipeline_mode = #tpu.pipeline_mode<synchronous>, transform_indices = @transform_5, window_bounds = array<i64: 1, 32>}, {pipeline_mode = #tpu.pipeline_mode<synchronous>, transform_indices = @transform_6, window_bounds = array<i64: 256, 32>}, {pipeline_mode = #tpu.pipeline_mode<synchronous>, transform_indices = @transform_7, window_bounds = array<i64: 1, 32>}, {pipeline_mode = #tpu.pipeline_mode<synchronous>, transform_indices = @transform_8, window_bounds = array<i64: 1, 32>}, {pipeline_mode = #tpu.pipeline_mode<synchronous>, transform_indices = @transform_9, window_bounds = array<i64: 16, 32>}, {pipeline_mode = #tpu.pipeline_mode<synchronous>, transform_indices = @transform_10, window_bounds = array<i64: 1, 32>}, {transform_indices = @transform_11, window_bounds = array<i64: 24, 32>}, {transform_indices = @transform_12, window_bounds = array<i64: 24, 16>}, {transform_indices = @transform_13, window_bounds = array<i64: 24, 16>}, {transform_indices = @transform_14, window_bounds = array<i64: 24, 16>}, {transform_indices = @transform_15, window_bounds = array<i64: 24, 16>}]} {
    %c0 = arith.constant 0 : index
    %c0_0 = arith.constant 0 : index
    %0 = vector.load %arg1[%c0, %c0_0] : memref<24x80xf32, #tpu.memory_space<vmem>>, vector<24x80xf32>
    %1 = arith.cmpf one, %0, %0 : vector<24x80xf32>
    %cst = arith.constant 0.000000e+00 : f32
    %2 = vector.broadcast %cst : f32 to vector<24x80xf32>
    %3 = arith.select %1, %2, %0 : vector<24x80xi1>, vector<24x80xf32>
    %cst_1 = arith.constant -3.40282347E+38 : f32
    %cst_2 = arith.constant 3.40282347E+38 : f32
    %4 = vector.broadcast %cst_1 : f32 to vector<24x80xf32>
    %5 = arith.maximumf %4, %3 : vector<24x80xf32>
    %6 = vector.broadcast %cst_2 : f32 to vector<24x80xf32>
    %7 = arith.minimumf %6, %5 : vector<24x80xf32>
    %c0_3 = arith.constant 0 : index
    %c0_4 = arith.constant 0 : index
    %8 = vector.load %arg5[%c0_3, %c0_4] : memref<80x32xf32, #tpu.memory_space<vmem>>, vector<80x32xf32>
    %cst_5 = arith.constant dense<0.000000e+00> : vector<24x32xf32>
    %9 = tpu.matmul %7, %8, %cst_5 {dimension_numbers = #tpu.dot_dimension_numbers<[1], [0], [0], [1], [0, 0, 1, 1], [], []>} : vector<24x80xf32>, vector<80x32xf32>, vector<24x32xf32> -> vector<24x32xf32>
    %c0_6 = arith.constant 0 : index
    %c0_7 = arith.constant 0 : index
    %10 = vector.load %arg6[%c0_6, %c0_7] : memref<1x32xf32, #tpu.memory_space<vmem>>, vector<1x32xf32>
    %11 = vector.broadcast %10 : vector<1x32xf32> to vector<24x32xf32>
    %12 = arith.addf %9, %11 : vector<24x32xf32>
    %13 = vector.extract_strided_slice %12 {offsets = [0, 0], sizes = [24, 16], strides = [1, 1]} : vector<24x32xf32> to vector<24x16xf32>
    %14 = vector.extract_strided_slice %12 {offsets = [0, 16], sizes = [24, 16], strides = [1, 1]} : vector<24x32xf32> to vector<24x16xf32>
    %c0_8 = arith.constant 0 : index
    %c0_9 = arith.constant 0 : index
    %15 = vector.load %arg2[%c0_8, %c0_9] : memref<24x256xf32, #tpu.memory_space<vmem>>, vector<24x256xf32>
    %c0_10 = arith.constant 0 : index
    %c0_11 = arith.constant 0 : index
    %16 = vector.load %arg7[%c0_10, %c0_11] : memref<256x32xf32, #tpu.memory_space<vmem>>, vector<256x32xf32>
    %cst_12 = arith.constant dense<0.000000e+00> : vector<24x32xf32>
    %17 = tpu.matmul %15, %16, %cst_12 {dimension_numbers = #tpu.dot_dimension_numbers<[1], [0], [0], [1], [0, 0, 1, 1], [], []>} : vector<24x256xf32>, vector<256x32xf32>, vector<24x32xf32> -> vector<24x32xf32>
    %c0_13 = arith.constant 0 : index
    %c0_14 = arith.constant 0 : index
    %18 = vector.load %arg3[%c0_13, %c0_14] : memref<24x1xf32, #tpu.memory_space<vmem>>, vector<24x1xf32>
    %c0_15 = arith.constant 0 : index
    %c0_16 = arith.constant 0 : index
    %19 = vector.load %arg8[%c0_15, %c0_16] : memref<1x32xf32, #tpu.memory_space<vmem>>, vector<1x32xf32>
    %20 = vector.broadcast %18 : vector<24x1xf32> to vector<24x32xf32>
    %21 = vector.broadcast %19 : vector<1x32xf32> to vector<24x32xf32>
    %22 = arith.mulf %20, %21 : vector<24x32xf32>
    %23 = arith.addf %17, %22 : vector<24x32xf32>
    %c0_17 = arith.constant 0 : index
    %c0_18 = arith.constant 0 : index
    %24 = vector.load %arg9[%c0_17, %c0_18] : memref<1x32xf32, #tpu.memory_space<vmem>>, vector<1x32xf32>
    %25 = vector.broadcast %24 : vector<1x32xf32> to vector<24x32xf32>
    %26 = arith.addf %23, %25 : vector<24x32xf32>
    %27 = vector.extract_strided_slice %26 {offsets = [0, 0], sizes = [24, 16], strides = [1, 1]} : vector<24x32xf32> to vector<24x16xf32>
    %28 = vector.extract_strided_slice %26 {offsets = [0, 16], sizes = [24, 16], strides = [1, 1]} : vector<24x32xf32> to vector<24x16xf32>
    %cst_19 = arith.constant 5.000000e-01 : f32
    %29 = vector.broadcast %cst_19 : f32 to vector<24x16xf32>
    %30 = arith.mulf %29, %14 : vector<24x16xf32>
    %31 = math.exp %30 : vector<24x16xf32>
    %cst_20 = arith.constant 5.000000e-01 : f32
    %32 = vector.broadcast %cst_20 : f32 to vector<24x16xf32>
    %33 = arith.mulf %32, %28 : vector<24x16xf32>
    %34 = math.exp %33 : vector<24x16xf32>
    %c0_21 = arith.constant 0 : index
    %c0_22 = arith.constant 0 : index
    %35 = vector.load %arg4[%c0_21, %c0_22] : memref<24x16xf32, #tpu.memory_space<vmem>>, vector<24x16xf32>
    %36 = arith.mulf %35, %34 : vector<24x16xf32>
    %37 = arith.addf %36, %27 : vector<24x16xf32>
    %38 = arith.mulf %37, %31 : vector<24x16xf32>
    %39 = arith.addf %38, %13 : vector<24x16xf32>
    %c0_23 = arith.constant 0 : index
    %c0_24 = arith.constant 0 : index
    %40 = vector.load %arg10[%c0_23, %c0_24] : memref<16x32xf32, #tpu.memory_space<vmem>>, vector<16x32xf32>
    %cst_25 = arith.constant dense<0.000000e+00> : vector<24x32xf32>
    %41 = tpu.matmul %39, %40, %cst_25 {dimension_numbers = #tpu.dot_dimension_numbers<[1], [0], [0], [1], [0, 0, 1, 1], [], []>} : vector<24x16xf32>, vector<16x32xf32>, vector<24x32xf32> -> vector<24x32xf32>
    %c0_26 = arith.constant 0 : index
    %c0_27 = arith.constant 0 : index
    %42 = vector.load %arg11[%c0_26, %c0_27] : memref<1x32xf32, #tpu.memory_space<vmem>>, vector<1x32xf32>
    %43 = vector.broadcast %42 : vector<1x32xf32> to vector<24x32xf32>
    %44 = arith.addf %41, %43 : vector<24x32xf32>
    %c0_28 = arith.constant 0 : index
    %c0_29 = arith.constant 0 : index
    %45 = vector.load %arg12[%c0_28, %c0_29] : memref<24x32xf32, #tpu.memory_space<vmem>>, vector<24x32xf32>
    tpu.vector_store %arg12[%c0_28, %c0_29], %44 {strides = array<i32>} : memref<24x32xf32, #tpu.memory_space<vmem>>, vector<24x32xf32>,
    %c0_30 = arith.constant 0 : index
    %c0_31 = arith.constant 0 : index
    %46 = vector.load %arg13[%c0_30, %c0_31] : memref<24x16xf32, #tpu.memory_space<vmem>>, vector<24x16xf32>
    tpu.vector_store %arg13[%c0_30, %c0_31], %13 {strides = array<i32>} : memref<24x16xf32, #tpu.memory_space<vmem>>, vector<24x16xf32>,
    %c0_32 = arith.constant 0 : index
    %c0_33 = arith.constant 0 : index
    %47 = vector.load %arg14[%c0_32, %c0_33] : memref<24x16xf32, #tpu.memory_space<vmem>>, vector<24x16xf32>
    tpu.vector_store %arg14[%c0_32, %c0_33], %14 {strides = array<i32>} : memref<24x16xf32, #tpu.memory_space<vmem>>, vector<24x16xf32>,
    %c0_34 = arith.constant 0 : index
    %c0_35 = arith.constant 0 : index
    %48 = vector.load %arg15[%c0_34, %c0_35] : memref<24x16xf32, #tpu.memory_space<vmem>>, vector<24x16xf32>
    tpu.vector_store %arg15[%c0_34, %c0_35], %27 {strides = array<i32>} : memref<24x16xf32, #tpu.memory_space<vmem>>, vector<24x16xf32>,
    %c0_36 = arith.constant 0 : index
    %c0_37 = arith.constant 0 : index
    %49 = vector.load %arg16[%c0_36, %c0_37] : memref<24x16xf32, #tpu.memory_space<vmem>>, vector<24x16xf32>
    tpu.vector_store %arg16[%c0_36, %c0_37], %28 {strides = array<i32>} : memref<24x16xf32, #tpu.memory_space<vmem>>, vector<24x16xf32>,
    return
  }
  func.func @transform_0(%arg0: i32) -> (i32, i32) {
    %c0_i32 = arith.constant 0 : i32
    %c0_i32_0 = arith.constant 0 : i32
    return %arg0, %c0_i32 : i32, i32
  }
  func.func @transform_1(%arg0: i32) -> (i32, i32) {
    %c0_i32 = arith.constant 0 : i32
    %c0_i32_0 = arith.constant 0 : i32
    return %arg0, %c0_i32 : i32, i32
  }
  func.func @transform_2(%arg0: i32) -> (i32, i32) {
    %c0_i32 = arith.constant 0 : i32
    %c0_i32_0 = arith.constant 0 : i32
    return %arg0, %c0_i32 : i32, i32
  }
  func.func @transform_3(%arg0: i32) -> (i32, i32) {
    %c0_i32 = arith.constant 0 : i32
    %c0_i32_0 = arith.constant 0 : i32
    return %arg0, %c0_i32 : i32, i32
  }
  func.func @transform_4(%arg0: i32) -> (i32, i32) {
    %c0_i32 = arith.constant 0 : i32
    %c0_i32_0 = arith.constant 0 : i32
    %c0_i32_1 = arith.constant 0 : i32
    return %c0_i32, %c0_i32_0 : i32, i32
  }
  func.func @transform_5(%arg0: i32) -> (i32, i32) {
    %c0_i32 = arith.constant 0 : i32
    %c0_i32_0 = arith.constant 0 : i32
    %c0_i32_1 = arith.constant 0 : i32
    return %c0_i32, %c0_i32_0 : i32, i32
  }
  func.func @transform_6(%arg0: i32) -> (i32, i32) {
    %c0_i32 = arith.constant 0 : i32
    %c0_i32_0 = arith.constant 0 : i32
    %c0_i32_1 = arith.constant 0 : i32
    return %c0_i32, %c0_i32_0 : i32, i32
  }
  func.func @transform_7(%arg0: i32) -> (i32, i32) {
    %c0_i32 = arith.constant 0 : i32
    %c0_i32_0 = arith.constant 0 : i32
    %c0_i32_1 = arith.constant 0 : i32
    return %c0_i32, %c0_i32_0 : i32, i32
  }
  func.func @transform_8(%arg0: i32) -> (i32, i32) {
    %c0_i32 = arith.constant 0 : i32
    %c0_i32_0 = arith.constant 0 : i32
    %c0_i32_1 = arith.constant 0 : i32
    return %c0_i32, %c0_i32_0 : i32, i32
  }
  func.func @transform_9(%arg0: i32) -> (i32, i32) {
    %c0_i32 = arith.constant 0 : i32
    %c0_i32_0 = arith.constant 0 : i32
    %c0_i32_1 = arith.constant 0 : i32
    return %c0_i32, %c0_i32_0 : i32, i32
  }
  func.func @transform_10(%arg0: i32) -> (i32, i32) {
    %c0_i32 = arith.constant 0 : i32
    %c0_i32_0 = arith.constant 0 : i32
    %c0_i32_1 = arith.constant 0 : i32
    return %c0_i32, %c0_i32_0 : i32, i32
  }
  func.func @transform_11(%arg0: i32) -> (i32, i32) {
    %c0_i32 = arith.constant 0 : i32
    %c0_i32_0 = arith.constant 0 : i32
    return %arg0, %c0_i32 : i32, i32
  }
  func.func @transform_12(%arg0: i32) -> (i32, i32) {
    %c0_i32 = arith.constant 0 : i32
    %c0_i32_0 = arith.constant 0 : i32
    return %arg0, %c0_i32 : i32, i32
  }
  func.func @transform_13(%arg0: i32) -> (i32, i32) {
    %c0_i32 = arith.constant 0 : i32
    %c0_i32_0 = arith.constant 0 : i32
    return %arg0, %c0_i32 : i32, i32
  }
  func.func @transform_14(%arg0: i32) -> (i32, i32) {
    %c0_i32 = arith.constant 0 : i32
    %c0_i32_0 = arith.constant 0 : i32
    return %arg0, %c0_i32 : i32, i32
  }
  func.func @transform_15(%arg0: i32) -> (i32, i32) {
    %c0_i32 = arith.constant 0 : i32
    %c0_i32_0 = arith.constant 0 : i32
    return %arg0, %c0_i32 : i32, i32
  }
}

</mosaic_0001>

<bundles_post_ra>
// kernel: tpu_custom_call.1
= control target key start
LH: loop header
LB: loop body
LE: loop exit
PB: predicated region body
PF: predicated region fallthrough
CT: control target
= control target key end

     0   :  { %s3722_s0 = inlined_call_operand.vmem [shape: f32[38,80], index: 0, kind: input, shape index: {}]   ;;  %s3723_s1 = inlined_call_operand.vmem [shape: f32[38,256], index: 1, kind: input, shape index: {}]   ;;  %s3724_s2 = inlined_call_operand.vmem [shape: f32[38,1], index: 2, kind: input, shape index: {}]   ;;  %s3725_s3 = inlined_call_operand.vmem [shape: f32[38,16], index: 3, kind: input, shape index: {}]   ;;  %s3726_s4 = inlined_call_operand.vmem [shape: f32[80,32], index: 4, kind: input, shape index: {}]   ;;  %s3727_s5 = inlined_call_operand.vmem [shape: f32[1,32], index: 5, kind: input, shape index: {}]   ;;  %s3728_s6 = inlined_call_operand.vmem [shape: f32[256,32], index: 6, kind: input, shape index: {}]   ;;  %s3729_s7 = inlined_call_operand.vmem [shape: f32[1,32], index: 7, kind: input, shape index: {}]   ;;  %s3730_s8 = inlined_call_operand.vmem [shape: f32[1,32], index: 8, kind: input, shape index: {}]   ;;  %s3731_s9 = inlined_call_operand.vmem [shape: f32[16,32], index: 9, kind: input, shape index: {}]   ;;  %s3732_s10 = inlined_call_operand.vmem [shape: f32[1,32], index: 10, kind: input, shape index: {}]   ;;  %s3733_s11 = inlined_call_operand.vmem [shape: f32[38,32], index: 11, kind: output, shape index: {0}]   ;;  %s3734_s12 = inlined_call_operand.vmem [shape: f32[38,16], index: 12, kind: output, shape index: {1}]   ;;  %s3735_s13 = inlined_call_operand.vmem [shape: f32[38,16], index: 13, kind: output, shape index: {2}]   ;;  %s3736_s14 = inlined_call_operand.vmem [shape: f32[38,16], index: 14, kind: output, shape index: {3}]   ;;  %s3737_s15 = inlined_call_operand.vmem [shape: f32[38,16], index: 15, kind: output, shape index: {4}]  }
   0x1   :  { %3741 = sst [smem:[#allocation10_spill]] %s3722_s0 }
   0x2   :  { %3742 = sst [smem:[#allocation11_spill]] %s3723_s1 }
   0x3   :  { %3743 = sst [smem:[#allocation12_spill]] %s3724_s2 }
   0x4   :  { %3744 = sst [smem:[#allocation13_spill]] %s3725_s3 }
   0x5   :  { %3745 = sst [smem:[#allocation14_spill]] %s3726_s4 }
   0x6   :  { %3746 = sst [smem:[#allocation15_spill]] %s3736_s14 }
   0x7   :  { %3747 = sst [smem:[#allocation16_spill]] %s3737_s15 }
   0x8   :  { %s3287_s18 = smov 0   ;;  %s3289_s19 = smov 0  }
   0x9   :  { %s3291_s20 = smov 0  }
   0xa LB: > { %3748 = sst [smem:[#allocation7_spill]] %s3036_s19  ;;  %s3300_s21 = sadd.s32 4294967295, %s3040_s20   ;;  %s3040_s20 = sphi %s3291_s20, %s3759_s20   ;;  %s3036_s19 = sphi %s3289_s19, %s3761_s19   ;;  %s3032_s18 = sphi %s3287_s18, %s3760_s18  }
   0xb   : > { %s3302_s22 = sadd.s32 1, %s3040_s20   ;;  %s284_s24 = sadd.s32 1, %s3036_s19 }
   0xc   : > { %3749 = sst [smem:[#allocation8_spill]] %s3302_s22  ;;  %s281_s23 = ssub.s32 %s3040_s20, %s3302_s22 }
   0xd   : > { %p282_p0 = scmp.eq.s32.totalorder %s281_s23, 0  ;;  %p294_p1 = scmp.ne.s32.totalorder %s3036_s19, %s3032_s18 }
   0xe   : > { %p295_p2 = scmp.eq.s32.totalorder %s3300_s21, 1  ;;  %p2241_p3 = scmp.ge.s32.totalorder %s3040_s20, 1 }
   0xf   : > { %s3310_s25 = scalar_select %p282_p0, %s3036_s19, %s284_s24  }
  0x10   : > { %p3312_p4 = por %p295_p2, %p294_p1  ;;  %p515_p5 = scmp.lt.s32.totalorder %s3040_s20, 3 }
  0x11   : > { %3750 = sst [smem:[#allocation9_spill]] %s3310_s25 }
  0x12   : > { %p516_p6 = pnand %p2241_p3, %p515_p5 }
  0x13   : > { %v839_v0 = vld [vmem:[%s3728_s6 + $0x80] sm:$0xff] (!%p516_p6)  ;;  %v840_v1 = vld [vmem:[%s3728_s6 + $0x88] sm:$0xff] (!%p516_p6)  ;;  %s3326_s23 = smul.u32 (!%p516_p6), 3, %s3300_s21  ;;  %v841_v5 = vld [vmem:[%s3728_s6 + $0x90] sm:$0xff] (!%p516_p6)  ;;  %v3202_v7 = vmov (!%p516_p6), 0.0|0.0   ;;  %vm3203_vm0 = vmmov (!%p516_p6), 0  }
  0x14   : > { %519 = sbr.rel (%p516_p6) target bundleno = 967 (0x3c7), region = 64  ;;  %v823_v2 = vld [vmem:[%s3728_s6] sm:$0xff] (!%p516_p6)  ;;  %v2434_v3 = vpack.c.bf16 (!%p516_p6), %v840_v1, %v839_v0  ;;  %v824_v4 = vld [vmem:[%s3728_s6 + $0x8] sm:$0xff] (!%p516_p6)  ;;  %v842_v6 = vld [vmem:[%s3728_s6 + $0x98] sm:$0xff] (!%p516_p6)  ;;  %2419 = vmatprep.subr.bf16.mxu0 (!%p516_p6), %v3202_v7  ;;  %v3204_v13 = vmov (!%p516_p6), 0.0   ;;  %v3205_v14 = vmov (!%p516_p6), 0  }
  0x15   : > { %v2436_v8 = vpack.c.bf16 (!%p516_p6), %v824_v4, %v823_v2  ;;  %v2438_v9 = vpack.c.bf16 (!%p516_p6), %v842_v6, %v841_v5  ;;  %v825_v10 = vld [vmem:[%s3728_s6 + $0x10] sm:$0xff] (!%p516_p6)  ;;  %v826_v11 = vld [vmem:[%s3728_s6 + $0x18] sm:$0xff] (!%p516_p6)  ;;  %v843_v12 = vld [vmem:[%s3728_s6 + $0xa0] sm:$0xff] (!%p516_p6)  ;;  %p616_p7 = scmp.lt.s32.totalorder (!%p516_p6), %s3326_s23, 4  ;;  %2397 = vmatprep.mubr.msk.f32.mxu0 (!%p516_p6), %vm3203_vm0, %v3204_v13  ;;  %2824 = vset.pattern.permute.xlu0 (!%p516_p6), %v3205_v14  ;;  %s3752_s4 = sld [smem:[#allocation14_spill]] (!%p516_p6)  ;;  %vm727_vm3 = vcmask (!%p516_p6), 654336  }
  0x16   : > { %2435 = vmatprep.subr.bf16.mxu1 (!%p516_p6), %v2434_v3  ;;  %v844_v15 = vld [vmem:[%s3728_s6 + $0xa8] sm:$0xff] (!%p516_p6)  ;;  %2825 = vset.pattern.permute.xlu1 (!%p516_p6), %v3205_v14  ;;  %v2440_v16 = vpack.c.bf16 (!%p516_p6), %v826_v11, %v825_v10  ;;  %v827_v18 = vld [vmem:[%s3728_s6 + $0x20] sm:$0xff] (!%p516_p6)  ;;  %v845_v20 = vld [vmem:[%s3728_s6 + $0xb0] sm:$0xff] (!%p516_p6)  ;;  %s3753_s1 = sld [smem:[#allocation11_spill]] (!%p516_p6)  ;;  %s3754_s0 = sld [smem:[#allocation10_spill]] (!%p516_p6)  ;;  %vm1039_vm5 = vcmask (!%p516_p6), 130048  }
  0x17   : > { %2437 = vmatpush3.bf16.msra.mxu1 (!%p516_p6), %v2436_v8  ;;  %v2442_v17 = vpack.c.bf16 (!%p516_p6), %v844_v15, %v843_v12  ;;  %v828_v19 = vld [vmem:[%s3728_s6 + $0x28] sm:$0xff] (!%p516_p6)  ;;  %v846_v21 = vld [vmem:[%s3728_s6 + $0xb8] sm:$0xff] (!%p516_p6)  ;;  %v829_v25 = vld [vmem:[%s3728_s6 + $0x30] sm:$0xff] (!%p516_p6)  ;;  %s3755_s2 = sld [smem:[#allocation12_spill]] (!%p516_p6)  ;;  %s584_s15 = sand.u32 (!%p516_p6), 1, %s3032_s18   ;;  %vm1129_vm6 = vcmask (!%p516_p6), 261120  }
  0x18   : > { %2439 = vmatprep.subr.bf16.mxu1 (!%p516_p6), %v2438_v9  ;;  %v2444_v24 = vpack.c.bf16 (!%p516_p6), %v828_v19, %v827_v18  ;;  %v2446_v27 = vpack.c.bf16 (!%p516_p6), %v846_v21, %v845_v20  ;;  %v830_v28 = vld [vmem:[%s3728_s6 + $0x38] sm:$0xff] (!%p516_p6)  ;;  %v847_v31 = vld [vmem:[%s3728_s6 + $0xc0] sm:$0xff] (!%p516_p6)  ;;  %v848_v32 = vld [vmem:[%s3728_s6 + $0xc8] sm:$0xff] (!%p516_p6)  ;;  %s3206_s29 = smov (!%p516_p6), 112   ;;  %s3756_s3 = sld [smem:[#allocation13_spill]] (!%p516_p6) }
  0x19   : > { %v2448_v36 = vpack.c.bf16 (!%p516_p6), %v830_v28, %v829_v25  ;;  %v2450_v38 = vpack.c.bf16 (!%p516_p6), %v848_v32, %v847_v31  ;;  %v831_v39 = vld [vmem:[%s3728_s6 + $0x40] sm:$0xff] (!%p516_p6)  ;;  %v832_v40 = vld [vmem:[%s3728_s6 + $0x48] sm:$0xff] (!%p516_p6)  ;;  %v849_v41 = vld [vmem:[%s3728_s6 + $0xd0] sm:$0xff] (!%p516_p6) }
  0x1a   : > { %v850_v42 = vld [vmem:[%s3728_s6 + $0xd8] sm:$0xff] (!%p516_p6)  ;;  %v2452_v46 = vpack.c.bf16 (!%p516_p6), %v832_v40, %v831_v39  ;;  %v833_v47 = vld [vmem:[%s3728_s6 + $0x50] sm:$0xff] (!%p516_p6)  ;;  %v851_v53 = vld [vmem:[%s3728_s6 + $0xe0] sm:$0xff] (!%p516_p6) }
  0x1b   : > { %s617_s27 = scalar_select %p616_p7, %s3326_s23, 4  ;;  %v710_v22 = vld [vmem:[%s3752_s4] sm:$0xff]  ;;  %v711_v23 = vld [vmem:[%s3752_s4 + $0x8] sm:$0xff]  ;;  %2441 = vmatpush3.bf16.msra.mxu1 %v2440_v16  ;;  %v712_v29 = vld [vmem:[%s3752_s4 + $0x10] sm:$0xff]  ;;  %v2454_v49 = vpack.c.bf16 %v850_v42, %v849_v41 }
  0x1c   : > { %v2420_v26 = vpack.c.bf16 %v711_v23, %v710_v22  ;;  %2443 = vmatprep.subr.bf16.mxu1 %v2442_v17  ;;  %v713_v30 = vld [vmem:[%s3752_s4 + $0x18] sm:$0xff]  ;;  %v714_v34 = vld [vmem:[%s3752_s4 + $0x20] sm:$0xff]  ;;  %v715_v35 = vld [vmem:[%s3752_s4 + $0x28] sm:$0xff]  ;;  %s1193_s18 = ssub.s32 (%p3312_p4), 5, %s3326_s23 }
  0x1d   : > { %s2312_s24 = sshll.u32 %s617_s27, 4  ;;  %v2423_v33 = vpack.c.bf16 %v713_v30, %v712_v29  ;;  %s3395_s25 = sshll.u32 %s617_s27, 3  ;;  %v2426_v43 = vpack.c.bf16 %v715_v35, %v714_v34  ;;  %v716_v44 = vld [vmem:[%s3752_s4 + $0x30] sm:$0xff]  ;;  %v717_v45 = vld [vmem:[%s3752_s4 + $0x38] sm:$0xff]  ;;  %v852_v54 = vld [vmem:[%s3728_s6 + $0xe8] sm:$0xff] }
  0x1e   : > { %s3387_s28 = scalar_lea.vmem %s3753_s1, %s2312_s24  ;;  %2421 = vmatpush3.bf16.msra.mxu0 %v2420_v26  ;;  %s3415_s17 = scalar_lea.vmem %s3754_s0, %s3395_s25  ;;  %v834_v50 = vld [vmem:[%s3728_s6 + $0x58] sm:$0xff]  ;;  %v2429_v55 = vpack.c.bf16 %v717_v45, %v716_v44  ;;  %v718_v56 = vld [vmem:[%s3752_s4 + $0x40] sm:$0xff]  ;;  %v719_v57 = vld [vmem:[%s3752_s4 + $0x48] sm:$0xff]  ;;  %v2458_v61 = vpack.c.bf16 %v852_v54, %v851_v53 }
  0x1f   : > { %2422 = vmatprep.subr.bf16.mxu0 %v3202_v7  ;;  %2445 = vmatpush3.bf16.msra.mxu1 %v2444_v24  ;;  %v818_v37 = vld [vmem:[%s3387_s28 + $0x8] sm:$0xff]  ;;  %s650_s19 = scalar_lea.vmem %s3755_s2, %s3395_s25  ;;  %v695_v48 = vld [vmem:[%s3415_s17] sm:$0xff]  ;;  %v2456_v59 = vpack.c.bf16 %v834_v50, %v833_v47  ;;  %v853_v0 = vld [vmem:[%s3728_s6 + $0xf0] sm:$0xff]  ;;  %v2432_v2 = vpack.c.bf16 %v719_v57, %v718_v56  ;;  %p1194_p8 = scmp.lt.s32.totalorder (%p3312_p4), %s1193_s18, 3 }
  0x20   : > { %2447 = vmatprep.subr.bf16.mxu1 %v2446_v27  ;;  %947 = vmatprep.mubr.f32.mxu1 %v818_v37  ;;  %v855_v51 = vld [vmem:[%s650_s19] sm:$0xff]  ;;  %v857_v52 = vld [vmem:[%s650_s19 + $0x10] sm:$0xff]  ;;  %vm698_vm1 = vcmp.ne.f32.partialorder %v695_v48, %v695_v48  ;;  %v856_v58 = vld [vmem:[%s650_s19 + $0x8] sm:$0xff]  ;;  %s3497_s19 = smul.u32 24, %s584_s15  ;;  %s664_s15 = scalar_lea.vmem %s3756_s3, %s3395_s25 }
  0x21   : > { %861 = vperm.xlu0 %2824, %v855_v51   ;;  %871 = vperm.xlu1 %2825, %v857_v52   ;;  %v696_v60 = vld [vmem:[%s3415_s17 + $0x8] sm:$0xff]  ;;  %v835_v62 = vld [vmem:[%s3728_s6 + $0x60] sm:$0xff]  ;;  %v854_v1 = vld [vmem:[%s3728_s6 + $0xf8] sm:$0xff]  ;;  %v701_v3 = vsel %vm698_vm1, 0.0, %v695_v48 }
  0x22   : > { %2424 = vmatpush3.bf16.msra.mxu0 %v2423_v33  ;;  %v836_v63 = vld [vmem:[%s3728_s6 + $0x68] sm:$0xff]  ;;  %vm699_vm2 = vcmp.ne.f32.partialorder %v696_v60, %v696_v60  ;;  %v697_v5 = vld [vmem:[%s3415_s17 + $0x10] sm:$0xff]  ;;  %v2462_v6 = vpack.c.bf16 %v854_v1, %v853_v0  ;;  %v838_v9 = vld [vmem:[%s3728_s6 + $0x78] sm:$0xff]  ;;  %v2247_v10 = vclamps-f32 %v701_v3, 3.4028235e+38  ;;  %s3508_s20 = scalar_lea.vmem [#allocation3], %s3497_s19  }
  0x23   : > { %2425 = vmatprep.subr.bf16.mxu0 %v3202_v7  ;;  %2449 = vmatpush3.bf16.msra.mxu1 %v2448_v36  ;;  %v2460_v4 = vpack.c.bf16 %v836_v63, %v835_v62  ;;  %v837_v8 = vld [vmem:[%s3728_s6 + $0x70] sm:$0xff]  ;;  %v702_v11 = vsel %vm699_vm2, 0.0, %v696_v60  ;;  %vm700_vm4 = vcmp.ne.f32.partialorder %v697_v5, %v697_v5  ;;  %v817_v16 = vld [vmem:[%s3387_s28] sm:$0xff]  ;;  %v820_v17 = vld [vmem:[%s3387_s28 + $0x18] sm:$0xff]  ;;  %s3528_s17 = scalar_lea.vmem [#allocation5], %s3497_s19   ;;  %s3551_s25 = scalar_lea.vmem [#allocation4], %s3497_s19  }
  0x24   : > { %2451 = vmatprep.subr.bf16.mxu1 %v2450_v38  ;;  %v2464_v12 = vpack.c.bf16 %v838_v9, %v837_v8  ;;  %v2248_v14 = vclamps-f32 %v702_v11, 3.4028235e+38  ;;  %v703_v15 = vsel %vm700_vm4, 0.0, %v697_v5  ;;  %v822_v19 = vld [vmem:[%s3387_s28 + $0x28] sm:$0xff]  ;;  %v821_v20 = vld [vmem:[%s3387_s28 + $0x20] sm:$0xff]  ;;  %s3565_s22 = scalar_lea.vmem [#allocation6], %s3497_s19  }
  0x25   : > { %866 = vperm.xlu0 %2824, %v856_v58   ;;  %v2249_v18 = vclamps-f32 %v703_v15, 3.4028235e+38  ;;  %v1030_v21 = vld [vmem:[%s3731_s9] sm:$0xff]  ;;  %v1031_v22 = vld [vmem:[%s3731_s9 + $0x8] sm:$0xff]  ;;  %s3577_s14 = scalar_lea.vmem [#allocation2], %s3497_s19   ;;  %s2313_s19 = smul.u32 (%p3312_p4), 24, %s3300_s21 }
  0x26   : > { %2427 = vmatpush3.bf16.msra.mxu0 %v2426_v43  ;;  %v2467_v23 = vpack.c.bf16 %v1031_v22, %v1030_v21  ;;  %v2250_v24 = vld [vmem:[%s3727_s5] ss:$0 sm:$0xff]  ;;  %v993_v21 = vld [vmem:[%s664_s15 + $0x10] sm:$0xff] }
  0x27   : > { %2428 = vmatprep.subr.bf16.mxu0 %v3202_v7  ;;  %2453 = vmatpush3.bf16.msra.mxu1 %v2452_v46  ;;  %v2254_v28 = vld [vmem:[%s3729_s7] ss:$0 sm:$0xff]  ;;  %s3589_s30 = scalar_lea.vmem (%p3312_p4), %s3733_s11, %s2313_s19  }
  0x28   : > { %2455 = vmatprep.subr.bf16.mxu1 %v2454_v49  ;;  %v2255_v38 = vld [vmem:[%s3730_s8] ss:$0 sm:$0xff] }
  0x2a   : > { %2430 = vmatpush3.bf16.msra.mxu0 %v2429_v55 }
  0x2b   : > { %2431 = vmatprep.subr.bf16.mxu0 %v3202_v7  ;;  %2457 = vmatpush3.bf16.msra.mxu1 %v2456_v59 }
  0x2c   : > { %2459 = vmatprep.subr.bf16.mxu1 %v2458_v61 }
  0x2e   : > { %2433 = vmatpush3.bf16.msra.mxu0 %v2432_v2 }
  0x2f   : > { %2466 = vmatprep.subr.bf16.mxu0 %v3202_v7  ;;  %2461 = vmatpush3.bf16.msra.mxu1 %v2460_v4  ;;  %v819_v7 = vld [vmem:[%s3387_s28 + $0x10] sm:$0xff] }
  0x30   : > { %2463 = vmatprep.subr.bf16.mxu1 %v2462_v6 }
  0x31   : > { %2398 = vmatmul.mubr.msk.f32.vlgmr.msra.gmra.mrb[0].mxu0 %vm727_vm3, %v2247_v10 }
  0x32   : > { %2400 = vmatprep.mubr.msk.f32.mxu0 %vm3203_vm0, %v3204_v13  ;;  %2468 = vmatpush3.bf16.msra.mxu0 %v2467_v23 }
  0x33   : > { %2465 = vmatpush3.bf16.msra.mxu1 %v2464_v12  ;;  %v991_v12 = vld [vmem:[%s664_s15] sm:$0xff] }
  0x35   : > { %2401 = vmatmul.mubr.msk.f32.gmra.mrb[2].mxu0 %vm727_vm3, %v2248_v14 }
  0x36   : > { %2403 = vmatprep.mubr.msk.f32.mxu0 %vm3203_vm0, %v3204_v13  ;;  %948 = vmatmul.mubr.f32.vlgmr.msra.gmra.mrb[0].mxu1 %v817_v16  ;;  %v992_v16 = vld [vmem:[%s664_s15 + $0x8] sm:$0xff] }
  0x37   : > { %952 = vmatprep.mubr.f32.mxu1 %v820_v17 }
  0x39   : > { %2404 = vmatmul.mubr.msk.f32.gmra.mrb[4].mxu0 %vm727_vm3, %v2249_v18 }
  0x3a   : > { %2410 = vmatprep.mubr.msk.f32.mxu0 %vm3203_vm0, %v3204_v13  ;;  %953 = vmatmul.mubr.f32.gmra.mrb[2].mxu1 %v819_v7 }
  0x3b   : > { %957 = vmatprep.mubr.f32.mxu1 %v822_v19 }
  0x3e   : > { %958 = vmatmul.mubr.f32.gmra.mrb[4].mxu1 %v821_v20 }
  0xa0   : > { %v862_v29 = vpop.permute.xlu0 %861  ;;  %v872_v46 = vpop.permute.xlu1 %871 }
  0xa1   : > { %v880_v33 = vmul.f32 %v2254_v28, %v862_v29  ;;  %v882_v53 = vmul.f32 %v2254_v28, %v872_v46 }
  0xa4   : > { %v867_v39 = vpop.permute.xlu0 %866 }
  0xa5   : > { %v881_v48 = vmul.f32 %v2254_v28, %v867_v39 }
 0x104   : > { %v803_v25 = vpop.f32.mrb[0].mxu0 }
 0x105   : > { %v3502_v26 = vadd.f32 %v2250_v24, %v803_v25  ;;  %v2399_v27 = vpop.f32.mrb[1].mxu0 }
 0x107   : > { %1133 = vst.msk [vmem:[%s3508_s20] sm:$0xff] %vm1039_vm5, %v3502_v26  ;;  %v973_v45 = vmul.f32 0.5, %v3502_v26 }
 0x108   : > { %v808_v30 = vpop.f32.mrb[2].mxu0 }
 0x109   : > { %v3513_v31 = vadd.f32 %v2250_v24, %v808_v30  ;;  %v2402_v32 = vpop.f32.mrb[3].mxu0  ;;  %v2363_v34 = vpop.f32.mrb[0].mxu1  ;;  %v976_v54 = vmul.f32 1.442695, %v973_v45 }
 0x10a   : > { %v2364_v35 = vpop.f32.mrb[1].mxu1 }
 0x10b   : > { %1134 = vst.msk [vmem:[%s3508_s20 + $0x8] sm:$0xff] %vm1039_vm5, %v3513_v31  ;;  %v2365_v36 = vadd.f32 %v2364_v35, %v2363_v34  ;;  %v974_v59 = vmul.f32 0.5, %v3513_v31 }
 0x10c   : > { %v813_v37 = vpop.f32.mrb[4].mxu0 }
 0x10d   : > { %v3521_v40 = vadd.f32 %v2250_v24, %v813_v37  ;;  %v2405_v41 = vpop.f32.mrb[5].mxu0  ;;  %v950_v42 = vadd.f32 %v2365_v36, %v880_v33  ;;  %v2366_v43 = vpop.f32.mrb[2].mxu1  ;;  %v978_v0 = vmul.f32 1.442695, %v974_v59 }
 0x10e   : > { %v2367_v44 = vpop.f32.mrb[3].mxu1 }
 0x10f   : > { %1135 = vst.msk [vmem:[%s3508_s20 + $0x10] sm:$0xff] %vm1039_vm5, %v3521_v40  ;;  %v970_v47 = vadd.f32 %v2255_v38, %v950_v42  ;;  %v2368_v49 = vadd.f32 %v2367_v44, %v2366_v43  ;;  %v975_v1 = vmul.f32 0.5, %v3521_v40 }
 0x111   : > { %v982_v50 = vmul.f32 0.5, %v970_v47  ;;  %1151 = vst.msk [vmem:[%s3528_s17] sm:$0xff] %vm1039_vm5, %v970_v47  ;;  %v955_v51 = vadd.f32 %v2368_v49, %v881_v48  ;;  %v2369_v52 = vpop.f32.mrb[4].mxu1  ;;  %v980_v4 = vmul.f32 1.442695, %v975_v1 }
 0x112   : > { %v2370_v55 = vpop.f32.mrb[5].mxu1 }
 0x113   : > { %v985_v56 = vmul.f32 1.442695, %v982_v50  ;;  %v971_v57 = vadd.f32 %v2255_v38, %v955_v51  ;;  %v2371_v58 = vadd.f32 %v2370_v55, %v2369_v52 }
 0x115   : > { %2826 = vpow2.f32 %v985_v56  ;;  %v983_v60 = vmul.f32 0.5, %v971_v57  ;;  %1152 = vst.msk [vmem:[%s3528_s17 + $0x8] sm:$0xff] %vm1039_vm5, %v971_v57  ;;  %v960_v61 = vadd.f32 %v2371_v58, %v882_v53 }
 0x116   : > { %2828 = vpow2.f32 %v976_v54 }
 0x117   : > { %v987_v62 = vmul.f32 1.442695, %v983_v60  ;;  %v972_v63 = vadd.f32 %v2255_v38, %v960_v61  ;;  %v2256_v38 = vld [vmem:[%s3732_s10] ss:$0 sm:$0xff] }
 0x119   : > { %2830 = vpow2.f32 %v987_v62  ;;  %v984_v2 = vmul.f32 0.5, %v972_v63  ;;  %1153 = vst.msk [vmem:[%s3528_s17 + $0x10] sm:$0xff] %vm1039_vm5, %v972_v63 }
 0x11a   : > { %2832 = vpow2.f32 %v978_v0 }
 0x11b   : > { %v989_v3 = vmul.f32 1.442695, %v984_v2 }
 0x11d   : > { %2834 = vpow2.f32 %v989_v3 }
 0x11e   : > { %2836 = vpow2.f32 %v980_v4 }
 0x11f   : > { %v2827_v5 = vpop.eup %2826 }
 0x120   : > { %v2829_v6 = vpop.eup %2828  ;;  %997 = vrot.lane.b32.xlu1 %v2827_v5, %s3206_s29 }
 0x123   : > { %v2831_v8 = vpop.eup %2830 }
 0x124   : > { %999 = vrot.lane.b32.xlu0 %v2831_v8, %s3206_s29  ;;  %1015 = vrot.lane.b32.xlu1 %v2829_v6, %s3206_s29  ;;  %v2833_v9 = vpop.eup %2832 }
 0x127   : > { %v2835_v10 = vpop.eup %2834 }
 0x128   : > { %1001 = vrot.lane.b32.xlu0 %v2835_v10, %s3206_s29  ;;  %1017 = vrot.lane.b32.xlu1 %v2833_v9, %s3206_s29  ;;  %v2837_v11 = vpop.eup %2836 }
 0x12c   : > { %1139 = vrot.lane.b32.xlu1 %v3502_v26, %s3206_s29  ;;  %1019 = vrot.lane.b32.xlu0 %v2837_v11, %s3206_s29 }
 0x130   : > { %1143 = vrot.lane.b32.xlu1 %v3521_v40, %s3206_s29  ;;  %1141 = vrot.lane.b32.xlu0 %v3513_v31, %s3206_s29 }
 0x134   : > { %1159 = vrot.lane.b32.xlu1 %v971_v57, %s3206_s29  ;;  %1157 = vrot.lane.b32.xlu0 %v970_v47, %s3206_s29 }
 0x138   : > { %1161 = vrot.lane.b32.xlu0 %v972_v63, %s3206_s29 }
 0x192   : > { %v998_v14 = vpop.permute.xlu1 %997 }
 0x193   : > { %v1006_v15 = vmul.f32 %v998_v14, %v991_v12 }
 0x195   : > { %v1009_v17 = vadd.f32 %v1006_v15, %v970_v47 }
 0x196   : > { %v1000_v18 = vpop.permute.xlu0 %999  ;;  %v1016_v7 = vpop.permute.xlu1 %1015 }
 0x197   : > { %v1007_v19 = vmul.f32 %v1000_v18, %v992_v16  ;;  %v1024_v20 = vmul.f32 %v1016_v7, %v1009_v17 }
 0x199   : > { %v1027_v22 = vadd.f32 %v1024_v20, %v3502_v26  ;;  %v1010_v23 = vadd.f32 %v1007_v19, %v971_v57 }
 0x19a   : > { %v1002_v24 = vpop.permute.xlu0 %1001  ;;  %v1018_v25 = vpop.permute.xlu1 %1017 }
 0x19b   : > { %v1008_v27 = vmul.f32 %v1002_v24, %v993_v21  ;;  %v1025_v28 = vmul.f32 %v1018_v25, %v1010_v23  ;;  %2411 = vmatmul.mubr.msk.f32.vlgmr.msra.gmra.mrb[6].mxu0 %vm1039_vm5, %v1027_v22 }
 0x19c   : > { %2413 = vmatprep.mubr.msk.f32.mxu0 %vm3203_vm0, %v3204_v13 }
 0x19d   : > { %v1028_v29 = vadd.f32 %v1025_v28, %v3513_v31  ;;  %v1011_v30 = vadd.f32 %v1008_v27, %v972_v63 }
 0x19e   : > { %v1140_v32 = vpop.permute.xlu1 %1139  ;;  %v1020_v33 = vpop.permute.xlu0 %1019 }
 0x19f   : > { %1148 = vst.msk [vmem:[%s3551_s25] sm:$0xff] %vm1039_vm5, %v1140_v32  ;;  %v1026_v26 = vmul.f32 %v1020_v33, %v1011_v30  ;;  %2414 = vmatmul.mubr.msk.f32.gmra.mrb[8].mxu0 %vm1039_vm5, %v1028_v29 }
 0x1a0   : > { %2416 = vmatprep.mubr.msk.f32.mxu0 %vm3203_vm0, %v3204_v13 }
 0x1a1   : > { %v1029_v34 = vadd.f32 %v1026_v26, %v3521_v40 }
 0x1a2   : > { %v1144_v31 = vpop.permute.xlu1 %1143  ;;  %v1142_v35 = vpop.permute.xlu0 %1141 }
 0x1a3   : > { %1150 = vst.msk [vmem:[%s3551_s25 + $0x10] sm:$0xff] %vm1039_vm5, %v1144_v31  ;;  %1149 = vst.msk [vmem:[%s3551_s25 + $0x8] sm:$0xff] %vm1039_vm5, %v1142_v35  ;;  %2417 = vmatmul.mubr.msk.f32.gmra.mrb[10].mxu0 %vm1039_vm5, %v1029_v34 }
 0x1a6   : > { %v1160_v36 = vpop.permute.xlu1 %1159  ;;  %v1158_v37 = vpop.permute.xlu0 %1157 }
 0x1a7   : > { %1167 = vst.msk [vmem:[%s3565_s22 + $0x8] sm:$0xff] %vm1039_vm5, %v1160_v36  ;;  %1166 = vst.msk [vmem:[%s3565_s22] sm:$0xff] %vm1039_vm5, %v1158_v37 }
 0x1aa   : > { %v1162_v13 = vpop.permute.xlu0 %1161 }
 0x1ab   : > { %1168 = vst.msk [vmem:[%s3565_s22 + $0x10] sm:$0xff] %vm1039_vm5, %v1162_v13 }
 0x26e   : > { %v1115_v39 = vpop.f32.mrb[6].mxu0 }
 0x26f   : > { %v1116_v40 = vadd.f32 %v2256_v38, %v1115_v39  ;;  %v2412_v41 = vpop.f32.mrb[7].mxu0 }
 0x271   : > { %1130 = vst.msk [vmem:[%s3577_s14] sm:$0xff] %vm1129_vm6, %v1116_v40 }
 0x272   : > { %v1120_v42 = vpop.f32.mrb[8].mxu0 }
 0x273   : > { %v1121_v43 = vadd.f32 %v2256_v38, %v1120_v42  ;;  %v2415_v44 = vpop.f32.mrb[9].mxu0  ;;  %1191 = sbr.rel (!%p3312_p4) target bundleno = 695 (0x2b7), region = 68 }
 0x275   : > { %1131 = vst.msk [vmem:[%s3577_s14 + $0x8] sm:$0xff] %vm1129_vm6, %v1121_v43 }
 0x276   : > { %v1125_v45 = vpop.f32.mrb[10].mxu0 }
 0x277   : > { %v1126_v46 = vadd.f32 %v2256_v38, %v1125_v45  ;;  %v2418_v47 = vpop.f32.mrb[11].mxu0 }
 0x279   : > { %1132 = vst.msk [vmem:[%s3577_s14 + $0x10] sm:$0xff] %vm1129_vm6, %v1126_v46 }
 0x27a   : > { %s3763_s18 = smov (!%p1194_p8, %s1193_s18), 3 }
 0x27b   : > { %s2260_s16 = sshll.u32 %s3763_s18, 7 }
 0x27c   : > { %p2263_p9 = scmp.eq.s32.totalorder %s2260_s16, 0 }
 0x27d   : > { %2838 = sdivrem.u32 (!%p2263_p9), %s3763_s18, 3 }
 0x27e   : > { %1202 = sbr.rel (%p2263_p9) target bundleno = 695 (0x2b7), region = 72 }
 0x286   : > { %s3595_s15 = spop.drf %2838 }
 0x287   : > { %p2264_p10 = scmp.le.s32.totalorder %s3595_s15, 0 }
 0x288   : > { %s3042_s24 = smov (!%p2264_p10), %s3589_s30   ;;  %s3046_s28 = smov (!%p2264_p10), %s3577_s14  }
 0x289   : > { %2028 = sbr.rel (%p2264_p10) target bundleno = 666 (0x29a), region = 445  ;;  %s3050_s27 = smov (!%p2264_p10), 0  }
 0x28a   : > { %s3054_s19 = smov (!%p2264_p10), 0  }
 0x290 LB: >> { %v1270_v48 = vld [vmem:[%s3048_s28] sm:$0xff]  ;;  %v1272_v49 = vld [vmem:[%s3048_s28 + $0x8] sm:$0xff]  ;;  %v1274_v50 = vld [vmem:[%s3048_s28 + $0x10] sm:$0xff]  ;;  %s1276_s29 = sadd.s32 1, %s3052_s27  ;;  %s1264_s19 = sadd.s32 1, %s3056_s19   ;;  %s3056_s19 = sphi %s3054_s19, %s1264_s19   ;;  %s3052_s27 = sphi %s3050_s27, %s3051_s27   ;;  %s3048_s28 = sphi %s3046_s28, %s1281_s28   ;;  %s3044_s24 = sphi %s3042_s24, %s1282_s24  }
 0x291   : >> { %1271 = vst [vmem:[%s3044_s24] sm:$0xff] %v1270_v48  ;;  %1273 = vst [vmem:[%s3044_s24 + $0x8] sm:$0xff] %v1272_v49  ;;  %p1277_p11 = scmp.ge.s32.totalorder %s1276_s29, %s3595_s15  ;;  %p1263_p12 = scmp.ge.s32.totalorder %s1264_s19, %s3595_s15 }
 0x292   : >> { %1275 = vst [vmem:[%s3044_s24 + $0x10] sm:$0xff] %v1274_v50 }
 0x293   : >> { %s3765_s29 = smov (%p1277_p11, %s1276_s29), 0  ;;  %1266 = sbr.rel (!%p1263_p12) target bundleno = 656 (0x290), region = 451 }
 0x294   : >> { %s1279_s16 = smul.u32 24, %s3765_s29  ;;  %s3051_s27 = smov %s3765_s29  }
 0x296   : >> { %s1281_s28 = scalar_lea.vmem %s3577_s14, %s1279_s16 [#allocation2]   ;;  %s1282_s24 = scalar_lea.vmem %s3589_s30, %s1279_s16  }
 0x29a PF: > { %2840 = sdivrem.u32 %s3763_s18, 3 }
 0x29b   : > { %s2265_s27 = smul.u32 24, %s3595_s15 }
 0x29d   : > { %s1287_s0 = scalar_lea.vmem %s3577_s14, %s2265_s27 [#allocation2]   ;;  %s1289_s1 = scalar_lea.vmem %s3589_s30, %s2265_s27  }
 0x2a3   : > { %s2841_s2 = spop.drf %2840 }
 0x2a4   : > { %p2267_p13 = scmp.le.s32.totalorder %s2841_s2, 0 }
 0x2a5   : > { %s3058_s16 = smov (!%p2267_p13), %s1289_s1   ;;  %s3062_s3 = smov (!%p2267_p13), %s1287_s0  }
 0x2a6   : > { %2042 = sbr.rel (%p2267_p13) target bundleno = 695 (0x2b7), region = 456  ;;  %s3066_s4 = smov (!%p2267_p13), 0  }
 0x2a7   : > { %s3070_s24 = smov (!%p2267_p13), 0  }
 0x2ad LB: >> { %v1299_v51 = vld [vmem:[%s3064_s3] sm:$0xff]  ;;  %s1301_s28 = sadd.s32 1, %s3068_s4  ;;  %s1293_s24 = sadd.s32 1, %s3072_s24   ;;  %s3072_s24 = sphi %s3070_s24, %s1293_s24   ;;  %s3068_s4 = sphi %s3066_s4, %s3067_s4   ;;  %s3064_s3 = sphi %s3062_s3, %s1306_s3   ;;  %s3060_s16 = sphi %s3058_s16, %s1307_s16  }
 0x2ae   : >> { %1300 = vst [vmem:[%s3060_s16] sm:$0xff] %v1299_v51  ;;  %p1302_p0 = scmp.ge.s32.totalorder %s1301_s28, %s2841_s2  ;;  %p1292_p1 = scmp.ge.s32.totalorder %s1293_s24, %s2841_s2 }
 0x2b0   : >> { %s3767_s28 = smov (%p1302_p0, %s1301_s28), 0  ;;  %1295 = sbr.rel (!%p1292_p1) target bundleno = 685 (0x2ad), region = 462 }
 0x2b1   : >> { %s2268_s14 = sshll.u32 %s3767_s28, 3  ;;  %s3067_s4 = smov %s3767_s28  }
 0x2b2   : >> { %s1306_s3 = scalar_lea.vmem %s1287_s0, %s2268_s14 [#allocation2]   ;;  %s1307_s16 = scalar_lea.vmem %s1289_s1, %s2268_s14  }
 0x2b7 PF: > { %1313 = sbr.rel (!%p3312_p4) target bundleno = 763 (0x2fb), region = 120  ;;  %s1315_s4 = ssub.s32 (%p3312_p4), 5, %s3326_s23 }
 0x2b8   : > { %s2314_s18 = smul.u32 (%p3312_p4), 24, %s3300_s21  ;;  %p1316_p2 = scmp.lt.s32.totalorder (%p3312_p4), %s1315_s4, 3 }
 0x2ba   : > { %s3615_s19 = scalar_lea.vmem (%p3312_p4), %s3734_s12, %s2314_s18  }
 0x2be   : > { %s3769_s4 = smov (!%p1316_p2, %s1315_s4), 3 }
 0x2bf   : > { %s2270_s3 = sshll.u32 %s3769_s4, 7 }
 0x2c0   : > { %p2273_p3 = scmp.eq.s32.totalorder %s2270_s3, 0 }
 0x2c1   : > { %2842 = sdivrem.u32 (!%p2273_p3), %s3769_s4, 3 }
 0x2c2   : > { %1324 = sbr.rel (%p2273_p3) target bundleno = 763 (0x2fb), region = 124 }
 0x2ca   : > { %s3621_s0 = spop.drf %2842 }
 0x2cb   : > { %p2274_p5 = scmp.le.s32.totalorder %s3621_s0, 0 }
 0x2cc   : > { %s3074_s1 = smov (!%p2274_p5), %s3615_s19   ;;  %s3078_s2 = smov (!%p2274_p5), %s3508_s20  }
 0x2cd   : > { %2056 = sbr.rel (%p2274_p5) target bundleno = 734 (0x2de), region = 467  ;;  %s3082_s29 = smov (!%p2274_p5), 0  }
 0x2ce   : > { %s3086_s27 = smov (!%p2274_p5), 0  }
 0x2d4 LB: >> { %v1392_v52 = vld [vmem:[%s3080_s2] sm:$0xff]  ;;  %v1394_v53 = vld [vmem:[%s3080_s2 + $0x8] sm:$0xff]  ;;  %v1396_v54 = vld [vmem:[%s3080_s2 + $0x10] sm:$0xff]  ;;  %s1398_s16 = sadd.s32 1, %s3084_s29  ;;  %s1386_s27 = sadd.s32 1, %s3088_s27   ;;  %s3088_s27 = sphi %s3086_s27, %s1386_s27   ;;  %s3084_s29 = sphi %s3082_s29, %s3083_s29   ;;  %s3080_s2 = sphi %s3078_s2, %s1403_s2   ;;  %s3076_s1 = sphi %s3074_s1, %s1404_s1  }
 0x2d5   : >> { %1393 = vst [vmem:[%s3076_s1] sm:$0xff] %v1392_v52  ;;  %1395 = vst [vmem:[%s3076_s1 + $0x8] sm:$0xff] %v1394_v53  ;;  %p1399_p6 = scmp.ge.s32.totalorder %s1398_s16, %s3621_s0  ;;  %p1385_p7 = scmp.ge.s32.totalorder %s1386_s27, %s3621_s0 }
 0x2d6   : >> { %1397 = vst [vmem:[%s3076_s1 + $0x10] sm:$0xff] %v1396_v54 }
 0x2d7   : >> { %s3771_s16 = smov (%p1399_p6, %s1398_s16), 0  ;;  %1388 = sbr.rel (!%p1385_p7) target bundleno = 724 (0x2d4), region = 473 }
 0x2d8   : >> { %s1401_s24 = smul.u32 24, %s3771_s16  ;;  %s3083_s29 = smov %s3771_s16  }
 0x2da   : >> { %s1403_s2 = scalar_lea.vmem %s3508_s20, %s1401_s24 [#allocation3]   ;;  %s1404_s1 = scalar_lea.vmem %s3615_s19, %s1401_s24  }
 0x2de PF: > { %2844 = sdivrem.u32 %s3769_s4, 3 }
 0x2df   : > { %s2275_s28 = smul.u32 24, %s3621_s0 }
 0x2e1   : > { %s1409_s14 = scalar_lea.vmem %s3508_s20, %s2275_s28 [#allocation3]   ;;  %s1411_s18 = scalar_lea.vmem %s3615_s19, %s2275_s28  }
 0x2e7   : > { %s2845_s30 = spop.drf %2844 }
 0x2e8   : > { %p2277_p8 = scmp.le.s32.totalorder %s2845_s30, 0 }
 0x2e9   : > { %s3090_s15 = smov (!%p2277_p8), %s1411_s18   ;;  %s3094_s3 = smov (!%p2277_p8), %s1409_s14  }
 0x2ea   : > { %2070 = sbr.rel (%p2277_p8) target bundleno = 763 (0x2fb), region = 478  ;;  %s3098_s29 = smov (!%p2277_p8), 0  }
 0x2eb   : > { %s3102_s1 = smov (!%p2277_p8), 0  }
 0x2f1 LB: >> { %v1421_v55 = vld [vmem:[%s3096_s3] sm:$0xff]  ;;  %s1423_s2 = sadd.s32 1, %s3100_s29  ;;  %s1415_s1 = sadd.s32 1, %s3104_s1   ;;  %s3104_s1 = sphi %s3102_s1, %s1415_s1   ;;  %s3100_s29 = sphi %s3098_s29, %s3099_s29   ;;  %s3096_s3 = sphi %s3094_s3, %s1428_s3   ;;  %s3092_s15 = sphi %s3090_s15, %s1429_s15  }
 0x2f2   : >> { %1422 = vst [vmem:[%s3092_s15] sm:$0xff] %v1421_v55  ;;  %p1424_p9 = scmp.ge.s32.totalorder %s1423_s2, %s2845_s30  ;;  %p1414_p10 = scmp.ge.s32.totalorder %s1415_s1, %s2845_s30 }
 0x2f4   : >> { %s3773_s2 = smov (%p1424_p9, %s1423_s2), 0  ;;  %1417 = sbr.rel (!%p1414_p10) target bundleno = 753 (0x2f1), region = 484 }
 0x2f5   : >> { %s2278_s20 = sshll.u32 %s3773_s2, 3  ;;  %s3099_s29 = smov %s3773_s2  }
 0x2f6   : >> { %s1428_s3 = scalar_lea.vmem %s1409_s14, %s2278_s20 [#allocation3]   ;;  %s1429_s15 = scalar_lea.vmem %s1411_s18, %s2278_s20  }
 0x2fb PF: > { %1435 = sbr.rel (!%p3312_p4) target bundleno = 831 (0x33f), region = 172  ;;  %s1437_s4 = ssub.s32 (%p3312_p4), 5, %s3326_s23 }
 0x2fc   : > { %s2315_s19 = smul.u32 (%p3312_p4), 24, %s3300_s21  ;;  %p1438_p11 = scmp.lt.s32.totalorder (%p3312_p4), %s1437_s4, 3 }
 0x2fe   : > { %s3641_s16 = scalar_lea.vmem (%p3312_p4), %s3735_s13, %s2315_s19  }
 0x302   : > { %s3775_s4 = smov (!%p1438_p11, %s1437_s4), 3 }
 0x303   : > { %s2280_s24 = sshll.u32 %s3775_s4, 7 }
 0x304   : > { %p2283_p12 = scmp.eq.s32.totalorder %s2280_s24, 0 }
 0x305   : > { %2846 = sdivrem.u32 (!%p2283_p12), %s3775_s4, 3 }
 0x306   : > { %1446 = sbr.rel (%p2283_p12) target bundleno = 831 (0x33f), region = 176 }
 0x30e   : > { %s3647_s28 = spop.drf %2846 }
 0x30f   : > { %p2284_p13 = scmp.le.s32.totalorder %s3647_s28, 0 }
 0x310   : > { %s3106_s14 = smov (!%p2284_p13), %s3641_s16   ;;  %s3110_s18 = smov (!%p2284_p13), %s3551_s25  }
 0x311   : > { %2084 = sbr.rel (%p2284_p13) target bundleno = 802 (0x322), region = 489  ;;  %s3114_s30 = smov (!%p2284_p13), 0  }
 0x312   : > { %s3118_s15 = smov (!%p2284_p13), 0  }
 0x318 LB: >> { %v1514_v56 = vld [vmem:[%s3112_s18] sm:$0xff]  ;;  %v1516_v57 = vld [vmem:[%s3112_s18 + $0x8] sm:$0xff]  ;;  %v1518_v58 = vld [vmem:[%s3112_s18 + $0x10] sm:$0xff]  ;;  %s1520_s3 = sadd.s32 1, %s3116_s30  ;;  %s1508_s15 = sadd.s32 1, %s3120_s15   ;;  %s3120_s15 = sphi %s3118_s15, %s1508_s15   ;;  %s3116_s30 = sphi %s3114_s30, %s3115_s30   ;;  %s3112_s18 = sphi %s3110_s18, %s1525_s18   ;;  %s3108_s14 = sphi %s3106_s14, %s1526_s14  }
 0x319   : >> { %1515 = vst [vmem:[%s3108_s14] sm:$0xff] %v1514_v56  ;;  %1517 = vst [vmem:[%s3108_s14 + $0x8] sm:$0xff] %v1516_v57  ;;  %p1521_p0 = scmp.ge.s32.totalorder %s1520_s3, %s3647_s28  ;;  %p1507_p1 = scmp.ge.s32.totalorder %s1508_s15, %s3647_s28 }
 0x31a   : >> { %1519 = vst [vmem:[%s3108_s14 + $0x10] sm:$0xff] %v1518_v58 }
 0x31b   : >> { %s3777_s3 = smov (%p1521_p0, %s1520_s3), 0  ;;  %1510 = sbr.rel (!%p1507_p1) target bundleno = 792 (0x318), region = 495 }
 0x31c   : >> { %s1523_s29 = smul.u32 24, %s3777_s3  ;;  %s3115_s30 = smov %s3777_s3  }
 0x31e   : >> { %s1525_s18 = scalar_lea.vmem %s3551_s25, %s1523_s29 [#allocation4]   ;;  %s1526_s14 = scalar_lea.vmem %s3641_s16, %s1523_s29  }
 0x322 PF: > { %2848 = sdivrem.u32 %s3775_s4, 3 }
 0x323   : > { %s2285_s1 = smul.u32 24, %s3647_s28 }
 0x325   : > { %s1531_s2 = scalar_lea.vmem %s3551_s25, %s2285_s1 [#allocation4]   ;;  %s1533_s20 = scalar_lea.vmem %s3641_s16, %s2285_s1  }
 0x32b   : > { %s2849_s19 = spop.drf %2848 }
 0x32c   : > { %p2287_p2 = scmp.le.s32.totalorder %s2849_s19, 0 }
 0x32d   : > { %s3122_s0 = smov (!%p2287_p2), %s1533_s20   ;;  %s3126_s27 = smov (!%p2287_p2), %s1531_s2  }
 0x32e   : > { %2098 = sbr.rel (%p2287_p2) target bundleno = 831 (0x33f), region = 500  ;;  %s3130_s24 = smov (!%p2287_p2), 0  }
 0x32f   : > { %s3134_s14 = smov (!%p2287_p2), 0  }
 0x335 LB: >> { %v1543_v59 = vld [vmem:[%s3128_s27] sm:$0xff]  ;;  %s1545_s18 = sadd.s32 1, %s3132_s24  ;;  %s1537_s14 = sadd.s32 1, %s3136_s14   ;;  %s3136_s14 = sphi %s3134_s14, %s1537_s14   ;;  %s3132_s24 = sphi %s3130_s24, %s3131_s24   ;;  %s3128_s27 = sphi %s3126_s27, %s1550_s27   ;;  %s3124_s0 = sphi %s3122_s0, %s1551_s0  }
 0x336   : >> { %1544 = vst [vmem:[%s3124_s0] sm:$0xff] %v1543_v59  ;;  %p1546_p3 = scmp.ge.s32.totalorder %s1545_s18, %s2849_s19  ;;  %p1536_p5 = scmp.ge.s32.totalorder %s1537_s14, %s2849_s19 }
 0x338   : >> { %s3779_s18 = smov (%p1546_p3, %s1545_s18), 0  ;;  %1539 = sbr.rel (!%p1536_p5) target bundleno = 821 (0x335), region = 506 }
 0x339   : >> { %s2288_s25 = sshll.u32 %s3779_s18, 3  ;;  %s3131_s24 = smov %s3779_s18  }
 0x33a   : >> { %s1550_s27 = scalar_lea.vmem %s1531_s2, %s2288_s25 [#allocation4]   ;;  %s1551_s0 = scalar_lea.vmem %s1533_s20, %s2288_s25  }
 0x33f PF: > { %1557 = sbr.rel (!%p3312_p4) target bundleno = 899 (0x383), region = 224  ;;  %s1559_s4 = ssub.s32 (%p3312_p4), 5, %s3326_s23 }
 0x340   : > { %s2316_s16 = smul.u32 (%p3312_p4), 24, %s3300_s21  ;;  %p1560_p6 = scmp.lt.s32.totalorder (%p3312_p4), %s1559_s4, 3 }
 0x341   : > { %s3757_s15 = sld [smem:[#allocation15_spill]] (%p3312_p4) }
 0x346   : > { %s3781_s4 = smov (!%p1560_p6, %s1559_s4), 3 }
 0x347   : > { %s3667_s3 = scalar_lea.vmem %s3757_s15, %s2316_s16   ;;  %s2290_s29 = sshll.u32 %s3781_s4, 7 }
 0x348   : > { %p2293_p7 = scmp.eq.s32.totalorder %s2290_s29, 0 }
 0x349   : > { %2850 = sdivrem.u32 (!%p2293_p7), %s3781_s4, 3 }
 0x34a   : > { %1568 = sbr.rel (%p2293_p7) target bundleno = 899 (0x383), region = 228 }
 0x352   : > { %s3673_s1 = spop.drf %2850 }
 0x353   : > { %p2294_p8 = scmp.le.s32.totalorder %s3673_s1, 0 }
 0x354   : > { %s3138_s2 = smov (!%p2294_p8), %s3667_s3   ;;  %s3142_s20 = smov (!%p2294_p8), %s3528_s17  }
 0x355   : > { %2112 = sbr.rel (%p2294_p8) target bundleno = 870 (0x366), region = 511  ;;  %s3146_s19 = smov (!%p2294_p8), 0  }
 0x356   : > { %s3150_s0 = smov (!%p2294_p8), 0  }
 0x35c LB: >> { %v1636_v60 = vld [vmem:[%s3144_s20] sm:$0xff]  ;;  %v1638_v61 = vld [vmem:[%s3144_s20 + $0x8] sm:$0xff]  ;;  %v1640_v62 = vld [vmem:[%s3144_s20 + $0x10] sm:$0xff]  ;;  %s1642_s27 = sadd.s32 1, %s3148_s19  ;;  %s1630_s0 = sadd.s32 1, %s3152_s0   ;;  %s3152_s0 = sphi %s3150_s0, %s1630_s0   ;;  %s3148_s19 = sphi %s3146_s19, %s3147_s19   ;;  %s3144_s20 = sphi %s3142_s20, %s1647_s20   ;;  %s3140_s2 = sphi %s3138_s2, %s1648_s2  }
 0x35d   : >> { %1637 = vst [vmem:[%s3140_s2] sm:$0xff] %v1636_v60  ;;  %1639 = vst [vmem:[%s3140_s2 + $0x8] sm:$0xff] %v1638_v61  ;;  %p1643_p9 = scmp.ge.s32.totalorder %s1642_s27, %s3673_s1  ;;  %p1629_p10 = scmp.ge.s32.totalorder %s1630_s0, %s3673_s1 }
 0x35e   : >> { %1641 = vst [vmem:[%s3140_s2 + $0x10] sm:$0xff] %v1640_v62 }
 0x35f   : >> { %s3783_s27 = smov (%p1643_p9, %s1642_s27), 0  ;;  %1632 = sbr.rel (!%p1629_p10) target bundleno = 860 (0x35c), region = 517 }
 0x360   : >> { %s1645_s24 = smul.u32 24, %s3783_s27  ;;  %s3147_s19 = smov %s3783_s27  }
 0x362   : >> { %s1647_s20 = scalar_lea.vmem %s3528_s17, %s1645_s24 [#allocation5]   ;;  %s1648_s2 = scalar_lea.vmem %s3667_s3, %s1645_s24  }
 0x366 PF: > { %2852 = sdivrem.u32 %s3781_s4, 3 }
 0x367   : > { %s2295_s14 = smul.u32 24, %s3673_s1 }
 0x369   : > { %s1653_s18 = scalar_lea.vmem %s3528_s17, %s2295_s14 [#allocation5]   ;;  %s1655_s25 = scalar_lea.vmem %s3667_s3, %s2295_s14  }
 0x36f   : > { %s2853_s16 = spop.drf %2852 }
 0x370   : > { %p2297_p11 = scmp.le.s32.totalorder %s2853_s16, 0 }
 0x371   : > { %s3154_s28 = smov (!%p2297_p11), %s1655_s25   ;;  %s3158_s30 = smov (!%p2297_p11), %s1653_s18  }
 0x372   : > { %2126 = sbr.rel (%p2297_p11) target bundleno = 899 (0x383), region = 522  ;;  %s3162_s15 = smov (!%p2297_p11), 0  }
 0x373   : > { %s3166_s29 = smov (!%p2297_p11), 0  }
 0x379 LB: >> { %v1665_v63 = vld [vmem:[%s3160_s30] sm:$0xff]  ;;  %s1667_s2 = sadd.s32 1, %s3164_s15  ;;  %s1659_s29 = sadd.s32 1, %s3168_s29   ;;  %s3168_s29 = sphi %s3166_s29, %s1659_s29   ;;  %s3164_s15 = sphi %s3162_s15, %s3163_s15   ;;  %s3160_s30 = sphi %s3158_s30, %s1672_s30   ;;  %s3156_s28 = sphi %s3154_s28, %s1673_s28  }
 0x37a   : >> { %1666 = vst [vmem:[%s3156_s28] sm:$0xff] %v1665_v63  ;;  %p1668_p12 = scmp.ge.s32.totalorder %s1667_s2, %s2853_s16  ;;  %p1658_p13 = scmp.ge.s32.totalorder %s1659_s29, %s2853_s16 }
 0x37c   : >> { %s3785_s2 = smov (%p1668_p12, %s1667_s2), 0  ;;  %1661 = sbr.rel (!%p1658_p13) target bundleno = 889 (0x379), region = 528 }
 0x37d   : >> { %s2298_s17 = sshll.u32 %s3785_s2, 3  ;;  %s3163_s15 = smov %s3785_s2  }
 0x37e   : >> { %s1672_s30 = scalar_lea.vmem %s1653_s18, %s2298_s17 [#allocation5]   ;;  %s1673_s28 = scalar_lea.vmem %s1655_s25, %s2298_s17  }
 0x383 PF: > { %1679 = sbr.rel (!%p3312_p4) target bundleno = 967 (0x3c7), region = 276  ;;  %s1681_s4 = ssub.s32 (%p3312_p4), 5, %s3326_s23 }
 0x384   : > { %s2317_s3 = smul.u32 (%p3312_p4), 24, %s3300_s21  ;;  %p1682_p0 = scmp.lt.s32.totalorder (%p3312_p4), %s1681_s4, 3 }
 0x385   : > { %s3758_s19 = sld [smem:[#allocation16_spill]] (%p3312_p4) }
 0x38a   : > { %s3787_s4 = smov (!%p1682_p0, %s1681_s4), 3 }
 0x38b   : > { %s3693_s0 = scalar_lea.vmem %s3758_s19, %s2317_s3   ;;  %s2300_s27 = sshll.u32 %s3787_s4, 7 }
 0x38c   : > { %p2303_p1 = scmp.eq.s32.totalorder %s2300_s27, 0 }
 0x38d   : > { %2854 = sdivrem.u32 (!%p2303_p1), %s3787_s4, 3 }
 0x38e   : > { %1690 = sbr.rel (%p2303_p1) target bundleno = 967 (0x3c7), region = 280 }
 0x396   : > { %s3699_s26 = spop.drf %2854 }
 0x397   : > { %p2304_p4 = scmp.le.s32.totalorder %s3699_s26, 0 }
 0x398   : > { %s3170_s21 = smov (!%p2304_p4), %s3693_s0   ;;  %s3174_s23 = smov (!%p2304_p4), %s3565_s22  }
 0x399   : > { %2140 = sbr.rel (%p2304_p4) target bundleno = 938 (0x3aa), region = 533  ;;  %s3178_s24 = smov (!%p2304_p4), 0  }
 0x39a   : > { %s3182_s14 = smov (!%p2304_p4), 0  }
 0x3a0 LB: >> { %v1758_v0 = vld [vmem:[%s3176_s23] sm:$0xff]  ;;  %v1760_v1 = vld [vmem:[%s3176_s23 + $0x8] sm:$0xff]  ;;  %v1762_v2 = vld [vmem:[%s3176_s23 + $0x10] sm:$0xff]  ;;  %s1764_s18 = sadd.s32 1, %s3180_s24  ;;  %s1752_s14 = sadd.s32 1, %s3184_s14   ;;  %s3184_s14 = sphi %s3182_s14, %s1752_s14   ;;  %s3180_s24 = sphi %s3178_s24, %s3179_s24   ;;  %s3176_s23 = sphi %s3174_s23, %s1769_s23   ;;  %s3172_s21 = sphi %s3170_s21, %s1770_s21  }
 0x3a1   : >> { %1759 = vst [vmem:[%s3172_s21] sm:$0xff] %v1758_v0  ;;  %1761 = vst [vmem:[%s3172_s21 + $0x8] sm:$0xff] %v1760_v1  ;;  %p1765_p2 = scmp.ge.s32.totalorder %s1764_s18, %s3699_s26  ;;  %p1751_p3 = scmp.ge.s32.totalorder %s1752_s14, %s3699_s26 }
 0x3a2   : >> { %1763 = vst [vmem:[%s3172_s21 + $0x10] sm:$0xff] %v1762_v2 }
 0x3a3   : >> { %s3789_s18 = smov (%p1765_p2, %s1764_s18), 0  ;;  %1754 = sbr.rel (!%p1751_p3) target bundleno = 928 (0x3a0), region = 539 }
 0x3a4   : >> { %s1767_s25 = smul.u32 24, %s3789_s18  ;;  %s3179_s24 = smov %s3789_s18  }
 0x3a6   : >> { %s1769_s23 = scalar_lea.vmem %s3565_s22, %s1767_s25 [#allocation6]   ;;  %s1770_s21 = scalar_lea.vmem %s3693_s0, %s1767_s25  }
 0x3aa PF: > { %2856 = sdivrem.u32 %s3787_s4, 3 }
 0x3ab   : > { %s2305_s16 = smul.u32 24, %s3699_s26 }
 0x3ad   : > { %s1775_s28 = scalar_lea.vmem %s3565_s22, %s2305_s16 [#allocation6]   ;;  %s1777_s30 = scalar_lea.vmem %s3693_s0, %s2305_s16  }
 0x3b3   : > { %s2857_s15 = spop.drf %2856 }
 0x3b4   : > { %p2307_p5 = scmp.le.s32.totalorder %s2857_s15, 0 }
 0x3b5   : > { %s3186_s29 = smov (!%p2307_p5), %s1777_s30   ;;  %s3190_s2 = smov (!%p2307_p5), %s1775_s28  }
 0x3b6   : > { %2154 = sbr.rel (%p2307_p5) target bundleno = 967 (0x3c7), region = 544  ;;  %s3194_s17 = smov (!%p2307_p5), 0  }
 0x3b7   : > { %s3198_s3 = smov (!%p2307_p5), 0  }
 0x3bd LB: >> { %v1787_v3 = vld [vmem:[%s3192_s2] sm:$0xff]  ;;  %s1789_s1 = sadd.s32 1, %s3196_s17  ;;  %s1781_s3 = sadd.s32 1, %s3200_s3   ;;  %s3200_s3 = sphi %s3198_s3, %s1781_s3   ;;  %s3196_s17 = sphi %s3194_s17, %s3195_s17   ;;  %s3192_s2 = sphi %s3190_s2, %s1794_s2   ;;  %s3188_s29 = sphi %s3186_s29, %s1795_s29  }
 0x3be   : >> { %1788 = vst [vmem:[%s3188_s29] sm:$0xff] %v1787_v3  ;;  %p1790_p6 = scmp.ge.s32.totalorder %s1789_s1, %s2857_s15  ;;  %p1780_p7 = scmp.ge.s32.totalorder %s1781_s3, %s2857_s15 }
 0x3c0   : >> { %s3791_s1 = smov (%p1790_p6, %s1789_s1), 0  ;;  %1783 = sbr.rel (!%p1780_p7) target bundleno = 957 (0x3bd), region = 550 }
 0x3c1   : >> { %s2308_s22 = sshll.u32 %s3791_s1, 3  ;;  %s3195_s17 = smov %s3791_s1  }
 0x3c2   : >> { %s1794_s2 = scalar_lea.vmem %s1775_s28, %s2308_s22 [#allocation6]   ;;  %s1795_s29 = scalar_lea.vmem %s1777_s30, %s2308_s22  }
 0x3c7 PF: > { %s3759_s20 = sld [smem:[#allocation8_spill]]  ;;  %s3760_s18 = sld [smem:[#allocation7_spill]] }
 0x3c8   : > { %s3761_s19 = sld [smem:[#allocation9_spill]] }
 0x3cd   : > { %p23_p8 = scmp.ge.s32.totalorder %s3759_s20, 4  }
 0x3cf   :  { %25 = sbr.rel (!%p23_p8) target bundleno = 10 (0xa), region = 561 }

</bundles_post_ra>
